<compile_context>
chip_gen: v7x
topology: tpu7x:2x2x1
jax: 0.10.0
libtpu: 0.0.40
codegen_flags: <defaults>
</compile_context>

<pallas_src>
import jax
import jax.numpy as jnp
from jax.experimental import pallas as pl
from jax.experimental.pallas import tpu as pltpu

D_Z = 19       # objectness + 3 coords + 3 shape + 2 size + 2 material + 8 color
N_SHAPE = 3    # sphere, cube, cylinder
SHAPE_LO, SHAPE_HI = 4, 7   # z[:, 4:7] -> shape probs

_LANE = 128
_MAX_TB = 2048  # lane-major tile size cap (KB-scale VMEM footprint, well within limits)


def _shape_valuation_kernel(z_ref, a_ref, o_ref):
    # z_ref: (3, TB) shape probs (transposed), a_ref: (3, TB) one-hot (transposed)
    # o_ref: (1, TB) lane-dense output
    z = z_ref[...].astype(jnp.float32)
    a = a_ref[...].astype(jnp.float32)
    # K=3 reduction unrolled as static row slices + two VPU adds (keeps XLU free).
    acc = a[0:1, :] * z[0:1, :]
    acc = acc + a[1:2, :] * z[1:2, :]
    acc = acc + a[2:3, :] * z[2:3, :]
    o_ref[...] = acc.astype(o_ref.dtype)


def _round_up(x, m):
    return ((x + m - 1) // m) * m


def slot_attention_shape_valuation(z, a):
    """Pallas equivalent of SlotAttentionShapeValuationFunction.forward."""
    B, D = z.shape
    assert D == D_Z, f"expected z with {D_Z} features, got {D}"
    assert a.shape == (B, N_SHAPE)

    # Pre-slice the 3 shape columns and put batch on the lane (last) axis.
    z_shape_t = z[:, SHAPE_LO:SHAPE_HI].T          # (3, B)
    a_t = a.T                                      # (3, B)

    # Lane-major tiling of the batch. Pad with zeros (0*0 = 0, sliced off below).
    tb = min(_MAX_TB, _round_up(B, _LANE))
    b_pad = _round_up(B, tb)
    if b_pad != B:
        pad = ((0, 0), (0, b_pad - B))
        z_shape_t = jnp.pad(z_shape_t, pad)
        a_t = jnp.pad(a_t, pad)

    grid = (b_pad // tb,)

    out = pl.pallas_call(
        _shape_valuation_kernel,
        out_shape=jax.ShapeDtypeStruct((1, b_pad), z.dtype),
        grid=grid,
        in_specs=[
            pl.BlockSpec((N_SHAPE, tb), lambda i: (0, i)),
            pl.BlockSpec((N_SHAPE, tb), lambda i: (0, i)),
        ],
        out_specs=pl.BlockSpec((1, tb), lambda i: (0, i)),
        compiler_params=pltpu.CompilerParams(
            dimension_semantics=("parallel",),
        ),
    )(z_shape_t, a_t)

    return out[0, :B]   # (B,)


def _reference(z, a):
    return (a * z[:, SHAPE_LO:SHAPE_HI]).sum(axis=1)


if __name__ == "__main__":
    key = jax.random.PRNGKey(0)
    kz, ka = jax.random.split(key)

    B = 8
    # Deterministic synthetic inputs: z ~ U(0,1), a = one-hot over shape classes.
    z = jax.random.uniform(kz, (B, D_Z), dtype=jnp.float32)
    shape_idx = jax.random.randint(ka, (B,), 0, N_SHAPE)
    a = jax.nn.one_hot(shape_idx, N_SHAPE, dtype=jnp.float32)

    out = slot_attention_shape_valuation(z, a)
    out = jax.block_until_ready(out)

    ref = _reference(z, a)
    assert out.shape == (B,)
    assert jnp.allclose(out, ref, atol=1e-6), (out, ref)
    print("KERNEL_OK")
</pallas_src>

<mosaic_0001>
module attributes {stable_mosaic.version = 11 : i64} {
  func.func @_shape_valuation_kernel(%arg0: i32, %arg1: memref<3x128xf32, #tpu.memory_space<vmem>>, %arg2: memref<3x128xf32, #tpu.memory_space<vmem>>, %arg3: memref<1x128xf32, #tpu.memory_space<vmem>>) attributes {dimension_semantics = [#tpu.dimension_semantics<parallel>], iteration_bounds = array<i64: 1>, scalar_prefetch = 0 : i64, scratch_operands = 0 : i64, tpu.core_type = #tpu.core_type<tc>, window_params = [{transform_indices = @transform_0, window_bounds = array<i64: 3, 128>}, {transform_indices = @transform_1, window_bounds = array<i64: 3, 128>}, {transform_indices = @transform_2, window_bounds = array<i64: 1, 128>}]} {
    %c0 = arith.constant 0 : index
    %c0_0 = arith.constant 0 : index
    %0 = vector.load %arg1[%c0, %c0_0] : memref<3x128xf32, #tpu.memory_space<vmem>>, vector<3x128xf32>
    %c0_1 = arith.constant 0 : index
    %c0_2 = arith.constant 0 : index
    %1 = vector.load %arg2[%c0_1, %c0_2] : memref<3x128xf32, #tpu.memory_space<vmem>>, vector<3x128xf32>
    %2 = vector.extract_strided_slice %1 {offsets = [0, 0], sizes = [1, 128], strides = [1, 1]} : vector<3x128xf32> to vector<1x128xf32>
    %3 = vector.extract_strided_slice %0 {offsets = [0, 0], sizes = [1, 128], strides = [1, 1]} : vector<3x128xf32> to vector<1x128xf32>
    %4 = arith.mulf %2, %3 : vector<1x128xf32>
    %5 = vector.extract_strided_slice %1 {offsets = [1, 0], sizes = [1, 128], strides = [1, 1]} : vector<3x128xf32> to vector<1x128xf32>
    %6 = vector.extract_strided_slice %0 {offsets = [1, 0], sizes = [1, 128], strides = [1, 1]} : vector<3x128xf32> to vector<1x128xf32>
    %7 = arith.mulf %5, %6 : vector<1x128xf32>
    %8 = arith.addf %4, %7 : vector<1x128xf32>
    %9 = vector.extract_strided_slice %1 {offsets = [2, 0], sizes = [1, 128], strides = [1, 1]} : vector<3x128xf32> to vector<1x128xf32>
    %10 = vector.extract_strided_slice %0 {offsets = [2, 0], sizes = [1, 128], strides = [1, 1]} : vector<3x128xf32> to vector<1x128xf32>
    %11 = arith.mulf %9, %10 : vector<1x128xf32>
    %12 = arith.addf %8, %11 : vector<1x128xf32>
    %c0_3 = arith.constant 0 : index
    %c0_4 = arith.constant 0 : index
    %13 = vector.load %arg3[%c0_3, %c0_4] : memref<1x128xf32, #tpu.memory_space<vmem>>, vector<1x128xf32>
    tpu.vector_store %arg3[%c0_3, %c0_4], %12 {strides = array<i32>} : memref<1x128xf32, #tpu.memory_space<vmem>>, vector<1x128xf32>,
    return
  }
  func.func @transform_0(%arg0: i32) -> (i32, i32) {
    %c0_i32 = arith.constant 0 : i32
    %c0_i32_0 = arith.constant 0 : i32
    return %c0_i32, %arg0 : i32, i32
  }
  func.func @transform_1(%arg0: i32) -> (i32, i32) {
    %c0_i32 = arith.constant 0 : i32
    %c0_i32_0 = arith.constant 0 : i32
    return %c0_i32, %arg0 : i32, i32
  }
  func.func @transform_2(%arg0: i32) -> (i32, i32) {
    %c0_i32 = arith.constant 0 : i32
    %c0_i32_0 = arith.constant 0 : i32
    return %c0_i32, %arg0 : i32, i32
  }
}

</mosaic_0001>

<bundles_post_ra>
// kernel: tpu_custom_call.1
= control target key start
LH: loop header
LB: loop body
LE: loop exit
PB: predicated region body
PF: predicated region fallthrough
CT: control target
= control target key end

     0   :  { %7 = vsyncpa [#allocation3], 0  ;;  %s192_s0 = inlined_call_operand.hbm [shape: f32[3,128], index: 0, kind: input, shape index: {}]   ;;  %s193_s1 = inlined_call_operand.hbm [shape: f32[3,128], index: 1, kind: input, shape index: {}]   ;;  %s194_s2 = inlined_call_operand.hbm [shape: f32[1,128], index: 2, kind: output, shape index: {}]  }
   0x1   :  { %8 = vsyncpa [#allocation6], 0 }
   0x2   :  { %9 = vsyncpa [#allocation4], 0  ;;  %s138_s9 = smov [#allocation2]   ;;  %s139_s11 = smov [#allocation5]  }
   0x3   :  { %s16_s10 = sshll.u32 %s138_s9, 4  ;;  %s26_s12 = sshll.u32 %s139_s11, 4  ;;  %s17_s10 = int_to_ptr.vmem [resolvable:$true] %s16_s10  ;;  %s27_s12 = int_to_ptr.vmem [resolvable:$true] %s26_s12 }
   0x4   :  { %s66_s15 = scalar_lea.hbm %s192_s0, 64 }
   0x5   :  { %p67_p0 = scmp.ne.s32.totalorder %s192_s0, %s66_s15  ;;  %p70_p1 = scmp.lt.u32.totalorder %s66_s15, %s192_s0 }
   0x7   :  { %p72_p2 = pnand %p70_p1, %p67_p0 }
   0x9   :  { %75 = shalt.err (!%p72_p2)
}
   0xa   :  { %s76_s20 = scalar_lea.vmem %s17_s10, 64  ;;  %p81_p4 = scmp.lt.s32.totalorder %s17_s10, %s17_s10 }
   0xb   :  { %p77_p3 = scmp.ne.s32.totalorder %s17_s10, %s76_s20  ;;  %p82_p5 = scmp.lt.s32.totalorder %s76_s20, %s76_s20 }
   0xd   :  { %p83_p6 = por %p82_p5, %p81_p4 }
   0xf   :  { %p84_p7 = pnand %p83_p6, %p77_p3 }
  0x11   :  { %87 = shalt.err (!%p84_p7)
}
  0x12   :  { %19 = dma.hbm_to_vmem [thread:$0]  %s192_s0, 64, %s17_s10, [#allocation3]  }
  0x13   :  { %s88_s25 = scalar_lea.hbm %s193_s1, 64 }
  0x14   :  { %p89_p8 = scmp.ne.s32.totalorder %s193_s1, %s88_s25  ;;  %p92_p9 = scmp.lt.u32.totalorder %s88_s25, %s193_s1 }
  0x16   :  { %p94_p10 = pnand %p92_p9, %p89_p8 }
  0x18   :  { %97 = shalt.err (!%p94_p10)
}
  0x19   :  { %s98_s30 = scalar_lea.vmem %s27_s12, 64  ;;  %p103_p12 = scmp.lt.s32.totalorder %s27_s12, %s27_s12 }
  0x1a   :  { %p99_p11 = scmp.ne.s32.totalorder %s27_s12, %s98_s30  ;;  %p104_p13 = scmp.lt.s32.totalorder %s98_s30, %s98_s30 }
  0x1c   :  { %p105_p0 = por %p104_p13, %p103_p12 }
  0x1e   :  { %p106_p1 = pnand %p105_p0, %p99_p11 }
  0x20   :  { %109 = shalt.err (!%p106_p1)
}
  0x21   :  { %29 = dma.hbm_to_vmem [thread:$0]  %s193_s1, 64, %s27_s12, [#allocation6]  }
  0x22   :  { %132 = dma.done.wait [#allocation3], 64  }
  0x23   :  { %133 = vsyncadd [#allocation3], 4294967232 }
  0x24   :  { %134 = dma.done.wait [#allocation6], 64  }
  0x25   :  { %135 = vsyncadd [#allocation6], 4294967232  ;;  %v36_v0 = vld [vmem:[#allocation2] sm:$0x7]  ;;  %v37_v1 = vld [vmem:[#allocation5] sm:$0x7] }
  0x26   :  { %v38_v2 = vmul.f32 %v37_v1, %v36_v0  ;;  %s140_s4 = smov [#allocation7]  }
  0x27   :  { %s53_s5 = sshll.u32 %s140_s4, 4  ;;  %s54_s5 = int_to_ptr.vmem [resolvable:$true] %s53_s5 }
  0x28   :  { %v40_v3 = vrot.slane %v38_v2, 1  ;;  %v43_v4 = vrot.slane %v38_v2, 2  ;;  %s110_s6 = scalar_lea.vmem %s54_s5, 16  ;;  %s114_s7 = scalar_lea.vmem %s54_s5, 32 }
  0x29   :  { %p111_p2 = scmp.ne.s32.totalorder %s54_s5, %s110_s6  ;;  %p115_p3 = scmp.lt.s32.totalorder %s54_s5, %s54_s5 }
  0x2a   :  { %v42_v5 = vadd.f32 %v40_v3, %v38_v2  ;;  %p116_p4 = scmp.lt.s32.totalorder %s114_s7, %s110_s6 }
  0x2c   :  { %v45_v6 = vadd.f32 %v43_v4, %v42_v5  ;;  %p117_p5 = por %p116_p4, %p115_p3 }
  0x2e   :  { %46 = vst [vmem:[#allocation7] sm:$0x1] %v45_v6  ;;  %p118_p6 = pnand %p117_p5, %p111_p2 }
  0x30   :  { %121 = shalt.err (!%p118_p6)
}
  0x31   :  { %s122_s9 = scalar_lea.hbm %s194_s2, 16 }
  0x32   :  { %p123_p7 = scmp.ne.s32.totalorder %s194_s2, %s122_s9  ;;  %p126_p8 = scmp.lt.u32.totalorder %s122_s9, %s194_s2 }
  0x34   :  { %p128_p9 = pnand %p126_p8, %p123_p7 }
  0x36   :  { %131 = shalt.err (!%p128_p9)
}
  0x37   :  { %56 = dma.vmem_to_hbm [thread:$0]  %s54_s5, 16, %s194_s2, [#allocation4]  }
  0x38   :  { %136 = dma.done.wait [#allocation4], 16  }
  0x39   :  { %137 = vsyncadd [#allocation4], 4294967280 }
  0x3a   :  { %60 = vsyncpa [#allocation3], 1 }
  0x3b   :  { %61 = vsyncpa [#allocation6], 1 }
  0x3c   :  { %62 = vsyncpa [#allocation4], 1 }

</bundles_post_ra>
